<compile_context>
chip_gen: v7x
topology: tpu7x:2x2x1
jax: 0.10.0
libtpu: 0.0.40
codegen_flags: <defaults>
</compile_context>

<pallas_src>
import functools

import jax
import jax.numpy as jnp
from jax.experimental import pallas as pl
from jax.experimental.pallas import tpu as pltpu


def _distill_kl_kernel(ys_ref, yt_ref, out_ref, acc_ref, *, inv_t, scale, rows,
                       tile_rows, tiles_per_core, needs_mask, core_split,
                       mxu_rowsum, approx_recip):
    if core_split:
        i = pl.program_id(1)
        flat_tile = pl.program_id(0) * tiles_per_core + i
    else:
        i = pl.program_id(0)
        flat_tile = i

    # Per-row f32 accumulator in VMEM, resident across the arbitrary axis.
    @pl.when(i == 0)
    def _init():
        acc_ref[...] = jnp.zeros_like(acc_ref)

    # Folded 1/T multiply (no per-element divide); cast bf16 -> f32 on chip.
    ys = ys_ref[...].astype(jnp.float32) * jnp.float32(inv_t)
    yt = yt_ref[...].astype(jnp.float32) * jnp.float32(inv_t)

    if mxu_rowsum:
        # The MXU is otherwise idle in this kernel: offload the long axis-1
        # sums to it via a dot with a ones matrix (exact sum, different order).
        ones = jnp.ones((ys.shape[1], 128), dtype=jnp.float32)

        def row_sum(x):
            return jnp.dot(x, ones, preferred_element_type=jnp.float32)[:, :1]
    else:
        def row_sum(x):
            return jnp.sum(x, axis=1, keepdims=True)

    # Student log-softmax pieces (numerically stable).
    ys_shift = ys - jnp.max(ys, axis=1, keepdims=True)
    ys_lse = jnp.log(row_sum(jnp.exp(ys_shift)))

    # Teacher softmax pieces; p_t is never materialized at (TB, C).
    yt_shift = yt - jnp.max(yt, axis=1, keepdims=True)
    yt_exp = jnp.exp(yt_shift)
    yt_sum = row_sum(yt_exp)
    log_zt = jnp.log(yt_sum)

    # KL per row:  sum_c p_t*(yt_shift - ys_shift) + (ys_lse - log_zt).
    # The per-row constant is folded at (TB, 1) width; no (TB, C) broadcast
    # add.  The reciprocal (EUP, approx by default) only scales the small
    # combined numerator, matching the exact-softmax normalization closely.
    row_dot = row_sum(yt_exp * (yt_shift - ys_shift))            # (TB, 1)
    row_num = row_dot + (ys_lse - log_zt) * yt_sum               # (TB, 1)
    row_kl = row_num * pl.reciprocal(yt_sum, approx=approx_recip)

    if needs_mask:
        # Per-row mask only: rows past the real batch (partial last tile or
        # clamped duplicate virtual tiles) are zeroed at the row-result level.
        # Garbage (NaN/Inf) from uninitialized padded rows is confined to its
        # own row by the per-row max/exp/sum, so this is exact.
        row_ids = flat_tile * tile_rows + jax.lax.broadcasted_iota(
            jnp.int32, (tile_rows, 1), 0)
        row_kl = jnp.where(row_ids < rows, row_kl, 0.0)

    acc_ref[...] += row_kl

    # Single cross-lane reduce + SMEM scalar write + scale, once per core.
    @pl.when(i == tiles_per_core - 1)
    def _finalize():
        out_ref[0, 0] = jnp.sum(acc_ref[...]) * jnp.float32(scale)


def _pick_tile_rows(b, c, in_itemsize, max_block_rows, input_buffers):
    """VMEM-aware batch-tile size (v7x has 64 MiB/TC vs 128 MiB on v5e/v6e)."""
    try:
        phys_vmem = int(pltpu.get_tpu_info().vmem_capacity_bytes)
    except Exception:
        phys_vmem = 64 * 1024 * 1024  # conservative fallback (v7x per-TC VMEM)
    vmem_limit = min(phys_vmem * 3 // 4, 100 * 1024 * 1024)
    # Per row of a tile: 2 inputs x `input_buffers` pipeline buffers at wire
    # dtype PLUS ~6 (TB, C) float32 intermediates live in the kernel body.
    per_row = 2 * input_buffers * c * in_itemsize + 6 * c * 4
    buf_budget = (vmem_limit * 7) // 10
    rows_cap = max(8, buf_budget // max(1, per_row))
    cap = min(rows_cap, max_block_rows)
    if b <= cap or b <= 8:
        tb = b
    else:
        tb = max(8, (cap // 8) * 8)  # tiled blocks need sublane alignment
    return tb, vmem_limit


def _make_in_spec(tb, c, index_map, buffers):
    """Input BlockSpec; optional deeper pipeline (guarded for API drift)."""
    if buffers > 2:
        try:
            return pl.BlockSpec((tb, c), index_map,
                                pipeline_mode=pl.Buffered(buffers))
        except TypeError:
            pass
    return pl.BlockSpec((tb, c), index_map)


def distill_kl(y_s, y_t, temperature, *, block_rows=None, max_block_rows=512,
               num_cores=1, core_parallel=False, cast_to_bf16=False,
               mxu_rowsum=None, approx_reciprocal=True, input_buffers=2):
    """Pallas TPU implementation of DistillKL(T).forward(y_s, y_t).

    num_cores / core_parallel: on v7x (2 TensorCores) pass num_cores=2 and
      core_parallel=True so the leading grid axis is pltpu.CORE_PARALLEL and
      each core accumulates its own partial.  Default (1) is best for the
      single-TC v5e/v6e: no duplicate clamped tile, no always-on mask.
    cast_to_bf16: cast f32 logits to bf16 on the HBM wire (halves DMA bytes;
      ~2x on HBM-bound v5e).  Small accuracy change since logits are
      pre-softmax.
    approx_reciprocal: use the EUP approximate reciprocal for the softmax
      normalization (deviation from exact F.kl_div is ~1e-3 relative on the
      per-row numerator, i.e. well below typical loss noise).
    """
    assert y_s.shape == y_t.shape and y_s.ndim == 2
    if cast_to_bf16 and y_s.dtype == jnp.float32:
        y_s = y_s.astype(jnp.bfloat16)
        y_t = y_t.astype(jnp.bfloat16)
    b, c = y_s.shape
    itemsize = jnp.dtype(y_s.dtype).itemsize

    input_buffers = max(2, int(input_buffers))
    tb_auto, vmem_limit = _pick_tile_rows(b, c, itemsize, max_block_rows,
                                          input_buffers)
    if block_rows is None:
        tb = tb_auto
    else:
        tb = min(int(block_rows), b)
        if tb < b:
            tb = max(8, (tb // 8) * 8)  # hardening: keep sublane alignment

    num_tiles = pl.cdiv(b, tb)
    if mxu_rowsum is None:
        mxu_rowsum = c >= 512

    core_split = (num_cores > 1) and (num_tiles >= num_cores)

    if core_split:
        tiles_per_core = pl.cdiv(num_tiles, num_cores)
        needs_mask = (num_cores * tiles_per_core * tb) != b
        last_tile = num_tiles - 1

        def in_index_map(p, i):
            # Clamp virtual tiles past the end onto the last real tile; their
            # rows are masked out (per-row) inside the kernel.
            return (jnp.minimum(p * tiles_per_core + i, last_tile), 0)

        grid = (num_cores, tiles_per_core)
        out_rows = num_cores
        out_spec = pl.BlockSpec((1, 1), lambda p, i: (p, 0),
                                memory_space=pltpu.SMEM)
        lead_sem = pltpu.CORE_PARALLEL if core_parallel else pltpu.PARALLEL
        dim_sem = (lead_sem, pltpu.ARBITRARY)
    else:
        tiles_per_core = num_tiles
        needs_mask = (num_tiles * tb) != b

        def in_index_map(i):
            return (i, 0)

        grid = (num_tiles,)
        out_rows = 1
        out_spec = pl.BlockSpec((1, 1), lambda i: (0, 0),
                                memory_space=pltpu.SMEM)
        dim_sem = (pltpu.ARBITRARY,)

    kernel = functools.partial(
        _distill_kl_kernel,
        inv_t=1.0 / float(temperature),
        scale=float(temperature) ** 2 / float(b),
        rows=b,
        tile_rows=tb,
        tiles_per_core=tiles_per_core,
        needs_mask=needs_mask,
        core_split=core_split,
        mxu_rowsum=bool(mxu_rowsum),
        approx_recip=bool(approx_reciprocal),
    )

    cost = pl.CostEstimate(
        flops=12 * b * c + 8 * b,            # shifts/sums/muls + per-row ops
        transcendentals=2 * b * c + 3 * b,   # exps + per-row logs/recip
        bytes_accessed=2 * b * c * itemsize + 4 * out_rows,
    )

    partials = pl.pallas_call(
        kernel,
        out_shape=jax.ShapeDtypeStruct((out_rows, 1), jnp.float32),
        grid=grid,
        in_specs=[
            _make_in_spec(tb, c, in_index_map, input_buffers),
            _make_in_spec(tb, c, in_index_map, input_buffers),
        ],
        out_specs=out_spec,
        scratch_shapes=[pltpu.VMEM((tb, 1), jnp.float32)],
        compiler_params=pltpu.CompilerParams(
            dimension_semantics=dim_sem,
            vmem_limit_bytes=int(vmem_limit),
        ),
        cost_estimate=cost,
    )(y_s, y_t)
    return jnp.sum(partials)


def _distill_kl_ref(y_s, y_t, temperature):
    """Pure-JAX reference for verification."""
    t = jnp.float32(temperature)
    ys = y_s.astype(jnp.float32) / t
    yt = y_t.astype(jnp.float32) / t
    log_p_s = jax.nn.log_softmax(ys, axis=1)
    p_t = jax.nn.softmax(yt, axis=1)
    log_p_t = jax.nn.log_softmax(yt, axis=1)
    return jnp.sum(p_t * (log_p_t - log_p_s)) / y_s.shape[0] * t * t


if __name__ == "__main__":
    key = jax.random.PRNGKey(0)
    ks = jax.random.split(key, 10)
    T = 4.0

    def check(out, ref, name):
        assert jnp.allclose(out, ref, rtol=2e-3, atol=5e-4), (name, out, ref)

    # Case 1: small shape implied by the module (batch=8 logits, 32 classes);
    # single tile, single-axis grid, no masking.
    y_s = jax.random.normal(ks[0], (8, 32), dtype=jnp.float32)
    y_t = jax.random.normal(ks[1], (8, 32), dtype=jnp.float32)
    out = jax.block_until_ready(distill_kl(y_s, y_t, T))
    check(out, _distill_kl_ref(y_s, y_t, T), "case1")

    # Case 2: batch-tiled + partial last tile (per-row masking path), bf16
    # logits kept bf16 on the HBM wire.
    y_s = jax.random.normal(ks[2], (200, 128), jnp.float32).astype(jnp.bfloat16)
    y_t = jax.random.normal(ks[3], (200, 128), jnp.float32).astype(jnp.bfloat16)
    out = jax.block_until_ready(distill_kl(y_s, y_t, T, block_rows=64))
    check(out, _distill_kl_ref(y_s, y_t, T), "case2")

    # Case 3: explicit 2-way core split with an odd tile count and b % tb == 0
    # -> masking driven purely by the clamped duplicate virtual tile
    # (review's requested unit test for the core-split path).
    y_s = jax.random.normal(ks[4], (72, 128), dtype=jnp.float32)
    y_t = jax.random.normal(ks[5], (72, 128), dtype=jnp.float32)
    out = jax.block_until_ready(
        distill_kl(y_s, y_t, 2.0, block_rows=8, num_cores=2))
    check(out, _distill_kl_ref(y_s, y_t, 2.0), "case3")

    # Case 4: larger class count -> MXU row-sum offload path, batch-tiled.
    y_s = jax.random.normal(ks[6], (64, 512), dtype=jnp.float32)
    y_t = jax.random.normal(ks[7], (64, 512), dtype=jnp.float32)
    out = jax.block_until_ready(distill_kl(y_s, y_t, T, block_rows=32))
    check(out, _distill_kl_ref(y_s, y_t, T), "case4")

    # Case 5: optional bf16-on-the-wire cast of f32 logits (HBM-bound v5e win);
    # reference computed on the same cast values.
    y_s = jax.random.normal(ks[8], (32, 128), dtype=jnp.float32)
    y_t = jax.random.normal(ks[9], (32, 128), dtype=jnp.float32)
    out = jax.block_until_ready(distill_kl(y_s, y_t, T, cast_to_bf16=True))
    ref = _distill_kl_ref(y_s.astype(jnp.bfloat16), y_t.astype(jnp.bfloat16), T)
    check(out, ref, "case5")

    print("KERNEL_OK")
</pallas_src>

<mosaic_0001>
module attributes {stable_mosaic.version = 11 : i64} {
  func.func @_distill_kl_kernel(%arg0: i32, %arg1: memref<8x32xf32, #tpu.memory_space<vmem>>, %arg2: memref<8x32xf32, #tpu.memory_space<vmem>>, %arg3: memref<1x1xf32, #tpu.memory_space<smem>>, %arg4: memref<8x1xf32, #tpu.memory_space<vmem>>) attributes {dimension_semantics = [#tpu.dimension_semantics<arbitrary>], iteration_bounds = array<i64: 1>, scalar_prefetch = 0 : i64, scratch_operands = 1 : i64, tpu.core_type = #tpu.core_type<tc>, window_params = [{transform_indices = @transform_0, window_bounds = array<i64: 8, 32>}, {transform_indices = @transform_1, window_bounds = array<i64: 8, 32>}, {transform_indices = @transform_2, window_bounds = array<i64: 1, 1>}]} {
    %c0_i32 = arith.constant 0 : i32
    %0 = arith.cmpi eq, %arg0, %c0_i32 : i32
    %1 = arith.extui %0 : i1 to i32
    %c0_i32_0 = arith.constant 0 : i32
    %2 = arith.cmpi ne, %1, %c0_i32_0 : i32
    scf.if %2 {
      %cst_16 = arith.constant 0.000000e+00 : f32
      %40 = vector.broadcast %cst_16 : f32 to vector<8x1xf32>
      %c0_17 = arith.constant 0 : index
      %c0_18 = arith.constant 0 : index
      %41 = vector.load %arg4[%c0_17, %c0_18] : memref<8x1xf32, #tpu.memory_space<vmem>>, vector<8x1xf32>
      tpu.vector_store %arg4[%c0_17, %c0_18], %40 {strides = array<i32>} : memref<8x1xf32, #tpu.memory_space<vmem>>, vector<8x1xf32>,
    } else {
    }
    %c0 = arith.constant 0 : index
    %c0_1 = arith.constant 0 : index
    %3 = vector.load %arg1[%c0, %c0_1] : memref<8x32xf32, #tpu.memory_space<vmem>>, vector<8x32xf32>
    %cst = arith.constant 2.500000e-01 : f32
    %4 = vector.broadcast %cst : f32 to vector<8x32xf32>
    %5 = arith.mulf %3, %4 : vector<8x32xf32>
    %c0_2 = arith.constant 0 : index
    %c0_3 = arith.constant 0 : index
    %6 = vector.load %arg2[%c0_2, %c0_3] : memref<8x32xf32, #tpu.memory_space<vmem>>, vector<8x32xf32>
    %cst_4 = arith.constant 2.500000e-01 : f32
    %7 = vector.broadcast %cst_4 : f32 to vector<8x32xf32>
    %8 = arith.mulf %6, %7 : vector<8x32xf32>
    %cst_5 = arith.constant dense<0xFF800000> : vector<8xf32>
    %9 = vector.multi_reduction <maximumf>, %5, %cst_5 [1] : vector<8x32xf32> to vector<8xf32>
    %10 = vector.shape_cast %9 : vector<8xf32> to vector<8x1xf32>
    %11 = vector.broadcast %10 : vector<8x1xf32> to vector<8x32xf32>
    %12 = arith.subf %5, %11 : vector<8x32xf32>
    %13 = math.exp %12 : vector<8x32xf32>
    %cst_6 = arith.constant dense<0.000000e+00> : vector<8xf32>
    %14 = vector.multi_reduction <add>, %13, %cst_6 [1] : vector<8x32xf32> to vector<8xf32>
    %15 = vector.shape_cast %14 : vector<8xf32> to vector<8x1xf32>
    %16 = math.log %15 : vector<8x1xf32>
    %cst_7 = arith.constant dense<0xFF800000> : vector<8xf32>
    %17 = vector.multi_reduction <maximumf>, %8, %cst_7 [1] : vector<8x32xf32> to vector<8xf32>
    %18 = vector.shape_cast %17 : vector<8xf32> to vector<8x1xf32>
    %19 = vector.broadcast %18 : vector<8x1xf32> to vector<8x32xf32>
    %20 = arith.subf %8, %19 : vector<8x32xf32>
    %21 = math.exp %20 : vector<8x32xf32>
    %cst_8 = arith.constant dense<0.000000e+00> : vector<8xf32>
    %22 = vector.multi_reduction <add>, %21, %cst_8 [1] : vector<8x32xf32> to vector<8xf32>
    %23 = vector.shape_cast %22 : vector<8xf32> to vector<8x1xf32>
    %24 = math.log %23 : vector<8x1xf32>
    %25 = arith.subf %20, %12 : vector<8x32xf32>
    %26 = arith.mulf %21, %25 : vector<8x32xf32>
    %cst_9 = arith.constant dense<0.000000e+00> : vector<8xf32>
    %27 = vector.multi_reduction <add>, %26, %cst_9 [1] : vector<8x32xf32> to vector<8xf32>
    %28 = vector.shape_cast %27 : vector<8xf32> to vector<8x1xf32>
    %29 = arith.subf %16, %24 : vector<8x1xf32>
    %30 = arith.mulf %29, %23 : vector<8x1xf32>
    %31 = arith.addf %28, %30 : vector<8x1xf32>
    %32 = tpu.reciprocal %23 {approx = true} : vector<8x1xf32> -> vector<8x1xf32>
    %33 = arith.mulf %31, %32 : vector<8x1xf32>
    %c0_10 = arith.constant 0 : index
    %c0_11 = arith.constant 0 : index
    %34 = vector.load %arg4[%c0_10, %c0_11] : memref<8x1xf32, #tpu.memory_space<vmem>>, vector<8x1xf32>
    %35 = arith.addf %34, %33 : vector<8x1xf32>
    %c0_12 = arith.constant 0 : index
    %c0_13 = arith.constant 0 : index
    %36 = vector.load %arg4[%c0_12, %c0_13] : memref<8x1xf32, #tpu.memory_space<vmem>>, vector<8x1xf32>
    tpu.vector_store %arg4[%c0_12, %c0_13], %35 {strides = array<i32>} : memref<8x1xf32, #tpu.memory_space<vmem>>, vector<8x1xf32>,
    %c0_i32_14 = arith.constant 0 : i32
    %37 = arith.cmpi eq, %arg0, %c0_i32_14 : i32
    %38 = arith.extui %37 : i1 to i32
    %c0_i32_15 = arith.constant 0 : i32
    %39 = arith.cmpi ne, %38, %c0_i32_15 : i32
    scf.if %39 {
      %c0_16 = arith.constant 0 : index
      %c0_17 = arith.constant 0 : index
      %40 = vector.load %arg4[%c0_16, %c0_17] : memref<8x1xf32, #tpu.memory_space<vmem>>, vector<8x1xf32>
      %41 = vector.shape_cast %40 : vector<8x1xf32> to vector<1x8x1xf32>
      %cst_18 = arith.constant dense<0.000000e+00> : vector<1xf32>
      %42 = vector.multi_reduction <add>, %41, %cst_18 [1, 2] : vector<1x8x1xf32> to vector<1xf32>
      %43 = vector.shape_cast %42 : vector<1xf32> to vector<1x1x1xf32>
      %44 = vector.extract %43[0, 0, 0] : f32 from vector<1x1x1xf32>
      %cst_19 = arith.constant 2.000000e+00 : f32
      %45 = arith.mulf %44, %cst_19 : f32
      %c0_20 = arith.constant 0 : index
      %c0_21 = arith.constant 0 : index
      %46 = memref.load %arg3[%c0_20, %c0_21] : memref<1x1xf32, #tpu.memory_space<smem>>
      memref.store %45, %arg3[%c0_20, %c0_21] : memref<1x1xf32, #tpu.memory_space<smem>>
    } else {
    }
    return
  }
  func.func @transform_0(%arg0: i32) -> (i32, i32) {
    %c0_i32 = arith.constant 0 : i32
    %c0_i32_0 = arith.constant 0 : i32
    return %arg0, %c0_i32 : i32, i32
  }
  func.func @transform_1(%arg0: i32) -> (i32, i32) {
    %c0_i32 = arith.constant 0 : i32
    %c0_i32_0 = arith.constant 0 : i32
    return %arg0, %c0_i32 : i32, i32
  }
  func.func @transform_2(%arg0: i32) -> (i32, i32) {
    %c0_i32 = arith.constant 0 : i32
    %c0_i32_0 = arith.constant 0 : i32
    %c0_i32_1 = arith.constant 0 : i32
    return %c0_i32, %c0_i32_0 : i32, i32
  }
}

</mosaic_0001>

<bundles_post_ra>
// kernel: tpu_custom_call.1
= control target key start
LH: loop header
LB: loop body
LE: loop exit
PB: predicated region body
PF: predicated region fallthrough
CT: control target
= control target key end

     0   :  { %7 = vsyncpa [#allocation4], 0  ;;  %s254_s0 = inlined_call_operand.hbm [shape: f32[8,32], index: 0, kind: input, shape index: {}]   ;;  %s255_s1 = inlined_call_operand.hbm [shape: f32[8,32], index: 1, kind: input, shape index: {}]   ;;  %s256_s2 = inlined_call_operand.hbm [shape: f32[1,1], index: 2, kind: output, shape index: {}]  }
   0x1   :  { %8 = vsyncpa [#allocation7], 0 }
   0x2   :  { %9 = vsyncpa [#allocation5], 0  ;;  %s191_s9 = smov [#allocation3]   ;;  %s192_s11 = smov [#allocation6]  }
   0x3   :  { %s16_s10 = sshll.u32 %s191_s9, 4  ;;  %s26_s12 = sshll.u32 %s192_s11, 4  ;;  %s17_s10 = int_to_ptr.vmem [resolvable:$true] %s16_s10  ;;  %s27_s12 = int_to_ptr.vmem [resolvable:$true] %s26_s12 }
   0x4   :  { %s131_s15 = scalar_lea.hbm %s254_s0, 128 }
   0x5   :  { %p132_p0 = scmp.ne.s32.totalorder %s254_s0, %s131_s15  ;;  %p135_p1 = scmp.lt.u32.totalorder %s131_s15, %s254_s0 }
   0x7   :  { %p137_p2 = pnand %p135_p1, %p132_p0 }
   0x9   :  { %140 = shalt.err (!%p137_p2)
}
   0xa   :  { %s141_s20 = scalar_lea.vmem %s17_s10, 128  ;;  %p146_p4 = scmp.lt.s32.totalorder %s17_s10, %s17_s10 }
   0xb   :  { %p142_p3 = scmp.ne.s32.totalorder %s17_s10, %s141_s20  ;;  %p147_p5 = scmp.lt.s32.totalorder %s141_s20, %s141_s20 }
   0xd   :  { %p148_p6 = por %p147_p5, %p146_p4 }
   0xf   :  { %p149_p7 = pnand %p148_p6, %p142_p3 }
  0x11   :  { %152 = shalt.err (!%p149_p7)
}
  0x12   :  { %19 = dma.hbm_to_vmem [thread:$0]  %s254_s0, 128, %s17_s10, [#allocation4]  }
  0x13   :  { %s153_s25 = scalar_lea.hbm %s255_s1, 128 }
  0x14   :  { %p154_p8 = scmp.ne.s32.totalorder %s255_s1, %s153_s25  ;;  %p157_p9 = scmp.lt.u32.totalorder %s153_s25, %s255_s1 }
  0x16   :  { %p159_p10 = pnand %p157_p9, %p154_p8 }
  0x18   :  { %162 = shalt.err (!%p159_p10)
}
  0x19   :  { %s163_s30 = scalar_lea.vmem %s27_s12, 128  ;;  %p168_p12 = scmp.lt.s32.totalorder %s27_s12, %s27_s12 }
  0x1a   :  { %p164_p11 = scmp.ne.s32.totalorder %s27_s12, %s163_s30  ;;  %p169_p13 = scmp.lt.s32.totalorder %s163_s30, %s163_s30 }
  0x1c   :  { %p170_p0 = por %p169_p13, %p168_p12 }
  0x1e   :  { %p171_p1 = pnand %p170_p0, %p164_p11 }
  0x20   :  { %174 = shalt.err (!%p171_p1)
}
  0x21   :  { %29 = dma.hbm_to_vmem [thread:$0]  %s255_s1, 128, %s27_s12, [#allocation7]  }
  0x22   :  { %185 = dma.done.wait [#allocation4], 128  }
  0x23   :  { %186 = vsyncadd [#allocation4], 4294967168 }
  0x24   :  { %187 = dma.done.wait [#allocation7], 128  }
  0x25   :  { %188 = vsyncadd [#allocation7], 4294967168  ;;  %v42_v0 = vld [vmem:[#allocation3] sm:$0xff]  ;;  %vm46_vm0 = vcmask 261120   ;;  %v44_v1 = vld [vmem:[#allocation6] sm:$0xff]  ;;  %vm40_vm1 = vcmask 7168  }
  0x26   :  { %v43_v2 = vmul.f32 0.25, %v42_v0  ;;  %v45_v3 = vmul.f32 0.25, %v44_v1  ;;  %v193_v19 = vmov 0.0   ;;  %s175_s7 = scalar_lea.hbm %s256_s2, 16 }
  0x27   :  { %41 = vst.msk [vmem:[#allocation2] sm:$0xff] %vm40_vm1, %v193_v19  ;;  %p176_p2 = scmp.ne.s32.totalorder %s256_s2, %s175_s7  ;;  %p179_p3 = scmp.lt.u32.totalorder %s175_s7, %s256_s2 }
  0x28   :  { %v47_v4 = vsel %vm46_vm0, %v43_v2, -inf  ;;  %v58_v5 = vsel %vm46_vm0, %v45_v3, -inf }
  0x29   :  { %48 = vmax.xlane.f32.xlu0 %v47_v4  ;;  %p181_p4 = pnand %p179_p3, %p176_p2 }
  0x2d   :  { %59 = vmax.xlane.f32.xlu0 %v58_v5 }
  0x2e   :  { %v79_v31 = vld [vmem:[#allocation2] sm:$0xff] }
  0xb6   :  { %v49_v6 = vpop.xlane.xlu0 %48 }
  0xb7   :  { %v50_v7 = vsub.f32 %v43_v2, %v49_v6 }
  0xb9   :  { %v51_v8 = vmul.f32 1.442695, %v50_v7 }
  0xba   :  { %v60_v9 = vpop.xlane.xlu0 %59 }
  0xbb   :  { %121 = vpow2.f32 %v51_v8  ;;  %v61_v10 = vsub.f32 %v45_v3, %v60_v9 }
  0xbd   :  { %v62_v11 = vmul.f32 1.442695, %v61_v10  ;;  %v69_v14 = vsub.f32 %v61_v10, %v50_v7 }
  0xbf   :  { %123 = vpow2.f32 %v62_v11 }
  0xc5   :  { %v122_v12 = vpop.eup %121 }
  0xc6   :  { %v53_v13 = vsel %vm46_vm0, %v122_v12, 0.0 }
  0xc7   :  { %54 = vadd.xlane.f32.xlu1 %v53_v13 }
  0xc9   :  { %v124_v15 = vpop.eup %123 }
  0xca   :  { %v64_v16 = vsel %vm46_vm0, %v124_v15, 0.0  ;;  %v70_v17 = vmul.f32 %v124_v15, %v69_v14 }
  0xcb   :  { %65 = vadd.xlane.f32.xlu1 %v64_v16 }
  0xcc   :  { %v71_v18 = vsel %vm46_vm0, %v70_v17, 0.0 }
  0xcd   :  { %72 = vadd.xlane.f32.xlu0 %v71_v18 }
 0x154   :  { %v55_v20 = vpop.xlane.xlu1 %54 }
 0x155   :  { %125 = vlog2.f32 %v55_v20 }
 0x158   :  { %v66_v21 = vpop.xlane.xlu1 %65 }
 0x159   :  { %127 = vlog2.f32 %v66_v21 }
 0x15a   :  { %129 = vrcp.f32 %v66_v21  ;;  %v73_v28 = vpop.xlane.xlu0 %72 }
 0x15f   :  { %v126_v22 = vpop.eup %125 }
 0x160   :  { %v57_v24 = vmul.f32 0.6931472, %v126_v22 }
 0x163   :  { %v128_v23 = vpop.eup %127 }
 0x164   :  { %v68_v25 = vmul.f32 0.6931472, %v128_v23  ;;  %v130_v30 = vpop.eup %129 }
 0x166   :  { %v74_v26 = vsub.f32 %v57_v24, %v68_v25 }
 0x168   :  { %v75_v27 = vmul.f32 %v74_v26, %v66_v21 }
 0x16a   :  { %v76_v29 = vadd.f32 %v75_v27, %v73_v28 }
 0x16c   :  { %v78_v32 = vmul.f32 %v130_v30, %v76_v29 }
 0x16e   :  { %v80_v33 = vadd.f32 %v79_v31, %v78_v32 }
 0x170   :  { %82 = vst.msk [vmem:[#allocation2] sm:$0xff] %vm40_vm1, %v80_v33 }
 0x177   :  { %v86_v34 = vld [vmem:[#allocation2] sm:$0xff] }
 0x178   :  { %v87_v35 = vsel %vm40_vm1, %v86_v34, 0.0 }
 0x179   :  { %88 = vadd.xlane.f32.xlu1 %v87_v35 }
 0x206   :  { %v89_v36 = vpop.xlane.xlu1 %88 }
 0x207   :  { %v90_v37 = vrot.slane %v89_v36, 4 }
 0x209   :  { %v91_v38 = vadd.f32 %v90_v37, %v89_v36 }
 0x20b   :  { %v92_v39 = vrot.slane %v91_v38, 2 }
 0x20d   :  { %v93_v40 = vadd.f32 %v92_v39, %v91_v38 }
 0x20f   :  { %v94_v41 = vrot.slane %v93_v40, 1 }
 0x211   :  { %v95_v42 = vadd.f32 %v94_v41, %v93_v40 }
 0x213   :  { %115 = vpush %v95_v42 }
 0x244   :  { %s116_s1 = spop %115 }
 0x245   :  { %s97_s4 = smul.f32 2.0, %s116_s1 }
 0x247   :  { %99 = sst [smem:[#allocation8]] %s97_s4 }
 0x248   :  { %184 = shalt.err (!%p181_p4)
}
 0x249   :  { %s194_s12 = smov [#allocation8]  }
 0x24a   :  { %107 = dma.smem_to_hbm %s194_s12, 16, %s256_s2, [#allocation5]  }
 0x24b   :  { %189 = dma.done.wait [#allocation5], 16  }
 0x24c   :  { %190 = vsyncadd [#allocation5], 4294967280 }
 0x24d   :  { %111 = sfence }
 0x24e   :  { %112 = vsyncpa [#allocation4], 1 }
 0x24f   :  { %113 = vsyncpa [#allocation7], 1 }
 0x250   :  { %114 = vsyncpa [#allocation5], 1 }

</bundles_post_ra>
